<compile_context>
chip_gen: v5e
topology: v5e:2x2
jax: 0.10.0
libtpu: 0.0.40
codegen_flags: <defaults>
</compile_context>

<pallas_src>
import math
import jax
import jax.numpy as jnp
from jax.experimental import pallas as pl
from jax.experimental.pallas import tpu as pltpu

BN_EPS = 1e-5
HEAD_HALF = 64            # lanes reserved per prediction head
OUT_W = 2 * HEAD_HALF     # fused head output width (lane-dense: 128)
LANE = 128


def _round_up(x, m):
    return ((x + m - 1) // m) * m


def _vmem_cap_bytes():
    try:
        return int(pltpu.get_tpu_info().vmem_capacity_bytes)
    except Exception:
        return 64 << 20        # conservative (v7x per-core VMEM)


def _vmem_limit(nbytes):
    # generation-aware ceiling, leaving ~16 MiB headroom for compiler scratch
    ceiling = max(_vmem_cap_bytes() - (16 << 20), 8 << 20)
    return int(min(max(int(nbytes) + (4 << 20), 8 << 20), ceiling))


def _pick_conv_tiles(n_pad):
    # dst tile: >=256 (amortise ~0.35us/step), capped for VMEM; src (reduction)
    # tile: cap so one bf16 A block is a few MiB regardless of graph size.
    tile_n = n_pad if n_pad <= 512 else 512
    while n_pad % tile_n:
        tile_n //= 2
    tile_k = n_pad if n_pad <= 4096 else 4096
    while n_pad % tile_k:
        tile_k //= 2
    return tile_n, tile_k


def _pick_pool_tile(n_pad):
    t = n_pad if n_pad <= 2048 else 2048
    while n_pad % t:
        t //= 2
    return t


# --------------------------------------------------------------------------- #
# Kernel 1: one GINConv layer, tiled over (dst-node tiles, src-node tiles).
#   acc[i] = (1+eps)*x[i] + sum_k A[i,k] @ x[k]
#   out[i] = ReLU(BN2(W2 @ ReLU(BN1(W1 @ acc[i]))))     (BN folded into W,b)
# --------------------------------------------------------------------------- #
def gin_conv_kernel(eps_ref, xsrc_ref, xdst_ref, a_ref,
                    w1_ref, b1_ref, w2_ref, b2_ref, out_ref, acc_ref):
    f32 = jnp.float32
    bf16 = jnp.bfloat16
    k = pl.program_id(1)

    @pl.when(k == 0)
    def _():
        acc_ref[...] = (1.0 + eps_ref[0]) * xdst_ref[...]

    # neighbor partial sum for this (dst tile, src tile): bf16 MXU, f32 acc
    acc_ref[...] += jnp.dot(a_ref[...], xsrc_ref[...], preferred_element_type=f32)

    @pl.when(k == pl.num_programs(1) - 1)
    def _():
        z = acc_ref[...]
        h = jnp.dot(z.astype(bf16), w1_ref[...], preferred_element_type=f32) + b1_ref[...]
        h = jnp.maximum(h, 0.0)
        h = jnp.dot(h.astype(bf16), w2_ref[...], preferred_element_type=f32) + b2_ref[...]
        out_ref[...] = jnp.maximum(h, 0.0)


def gin_conv_layer(x, a_bf16, layer_p):
    n_pad, f_in = x.shape
    h_out = layer_p['w2'].shape[1]
    tile_n, tile_k = _pick_conv_tiles(n_pad)
    x_src = x.astype(jnp.bfloat16)          # cast once, outside the kernel

    grid_spec = pltpu.PrefetchScalarGridSpec(
        num_scalar_prefetch=1,                                       # eps -> SMEM
        grid=(n_pad // tile_n, n_pad // tile_k),
        in_specs=[
            pl.BlockSpec((tile_k, f_in), lambda i, k, eps: (k, 0)),     # x (src, bf16)
            pl.BlockSpec((tile_n, f_in), lambda i, k, eps: (i, 0)),     # x (dst, f32)
            pl.BlockSpec((tile_n, tile_k), lambda i, k, eps: (i, k)),   # A tile (bf16)
            pl.BlockSpec((f_in, h_out), lambda i, k, eps: (0, 0)),      # w1 (BN folded)
            pl.BlockSpec((1, h_out), lambda i, k, eps: (0, 0)),         # b1
            pl.BlockSpec((h_out, h_out), lambda i, k, eps: (0, 0)),     # w2 (BN folded)
            pl.BlockSpec((1, h_out), lambda i, k, eps: (0, 0)),         # b2
        ],
        out_specs=pl.BlockSpec((tile_n, h_out), lambda i, k, eps: (i, 0)),
        scratch_shapes=[pltpu.VMEM((tile_n, f_in), jnp.float32)],       # accumulator
    )

    vmem = _vmem_limit(
        2 * tile_k * f_in * 2                 # x_src (double-buffered, bf16)
        + 2 * tile_n * f_in * 4               # x_dst
        + 2 * tile_n * tile_k * 2             # A tile
        + 2 * tile_n * h_out * 4              # out tile
        + tile_n * f_in * 4                   # accumulator scratch
        + (f_in * h_out + h_out * h_out) * 2 + 2 * h_out * 4)

    return pl.pallas_call(
        gin_conv_kernel,
        out_shape=jax.ShapeDtypeStruct((n_pad, h_out), jnp.float32),
        grid_spec=grid_spec,
        compiler_params=pltpu.CompilerParams(
            dimension_semantics=("parallel", "arbitrary"),
            vmem_limit_bytes=vmem),
    )(layer_p['eps'], x_src, x, a_bf16,
      layer_p['w1'], layer_p['b1'], layer_p['w2'], layer_p['b2'])


# --------------------------------------------------------------------------- #
# Kernel 2: lin1 (partial-sum form) + online masked attention pooling + fused
# heads, tiled over node tiles (graph-size independent VMEM footprint).
# --------------------------------------------------------------------------- #
def make_pool_head_kernel(nlayers):
    def kernel(*refs):
        xs_refs = refs[:nlayers]
        (mt_ref, lw_ref, lb_ref, gw_ref, gb_ref,
         hw1_ref, hb1_ref, hw2_ref, hb2_ref,
         out_ref, m_sc, l_sc, acc_sc) = refs[nlayers:]
        f32 = jnp.float32
        bf16 = jnp.bfloat16
        t = pl.program_id(0)

        @pl.when(t == 0)
        def _():
            m_sc[...] = jnp.full(m_sc.shape, -1e30, m_sc.dtype)
            l_sc[...] = jnp.zeros(l_sc.shape, l_sc.dtype)
            acc_sc[...] = jnp.zeros(acc_sc.shape, acc_sc.dtype)

        # h = relu(lin1(cat(xs, dim=1))) as a sum of per-layer partial matmuls
        h = lb_ref[...]
        for l in range(nlayers):
            h = h + jnp.dot(xs_refs[l][...].astype(bf16), lw_ref[l],
                            preferred_element_type=f32)
        h = jnp.maximum(h, 0.0)                                      # (T, H)

        # gate logits in (1, T) layout so per-graph math stays lane-major
        logit = jax.lax.dot_general(gw_ref[...], h, (((1,), (1,)), ((), ())),
                                    preferred_element_type=f32) + gb_ref[...]  # (1, T)

        mtf = mt_ref[...].astype(f32)                                # (G, T) in {0,1}
        lg = jnp.where(mtf > 0.0, logit, -1e30)                      # (G, T)
        m_old = m_sc[...]                                            # (G, 1)
        m_new = jnp.maximum(m_old, jnp.max(lg, axis=1, keepdims=True))
        alpha = jnp.exp(m_old - m_new)                               # (G, 1)
        p = jnp.exp(lg - m_new) * mtf                                # (G, T)
        l_sc[...] = alpha * l_sc[...] + jnp.sum(p, axis=1, keepdims=True)
        acc_sc[...] = alpha * acc_sc[...] + jnp.dot(
            p.astype(bf16), h.astype(bf16), preferred_element_type=f32)  # (G, H)
        m_sc[...] = m_new

        @pl.when(t == pl.num_programs(0) - 1)
        def _():
            pooled = acc_sc[...] / jnp.maximum(l_sc[...], 1e-30)     # (G, H)
            z = jnp.maximum(
                jnp.dot(pooled.astype(bf16), hw1_ref[...], preferred_element_type=f32)
                + hb1_ref[...], 0.0)                                 # (G, 2H)
            out_ref[...] = (jnp.dot(z.astype(bf16), hw2_ref[...],
                                    preferred_element_type=f32) + hb2_ref[...])
    return kernel


def pool_and_heads(xs, mt_t, p, *, g_pad):
    nlayers = len(xs)
    n_pad, h_pad = xs[0].shape
    tile_p = _pick_pool_tile(n_pad)

    in_specs = (
        [pl.BlockSpec((tile_p, h_pad), lambda t: (t, 0))] * nlayers       # xs tiles
        + [pl.BlockSpec((g_pad, tile_p), lambda t: (0, t)),               # mask^T (bf16)
           pl.BlockSpec(p['lin1_w'].shape, lambda t: (0, 0, 0)),
           pl.BlockSpec(p['lin1_b'].shape, lambda t: (0, 0)),
           pl.BlockSpec(p['gate_w'].shape, lambda t: (0, 0)),
           pl.BlockSpec(p['gate_b'].shape, lambda t: (0, 0)),
           pl.BlockSpec(p['hw1'].shape, lambda t: (0, 0)),
           pl.BlockSpec(p['hb1'].shape, lambda t: (0, 0)),
           pl.BlockSpec(p['hw2'].shape, lambda t: (0, 0)),
           pl.BlockSpec(p['hb2'].shape, lambda t: (0, 0))])
    out_specs = pl.BlockSpec((g_pad, OUT_W), lambda t: (0, 0))
    scratch = [pltpu.VMEM((g_pad, 1), jnp.float32),        # running max
               pltpu.VMEM((g_pad, 1), jnp.float32),        # running sum
               pltpu.VMEM((g_pad, h_pad), jnp.float32)]    # pooled accumulator

    operands = tuple(xs) + (mt_t, p['lin1_w'], p['lin1_b'], p['gate_w'], p['gate_b'],
                            p['hw1'], p['hb1'], p['hw2'], p['hb2'])
    weight_bytes = sum(int(a.size) * a.dtype.itemsize for a in operands[nlayers + 1:])
    vmem = _vmem_limit(
        2 * nlayers * tile_p * h_pad * 4 + 2 * g_pad * tile_p * 2
        + weight_bytes + g_pad * OUT_W * 4 + g_pad * (2 + h_pad) * 4)

    return pl.pallas_call(
        make_pool_head_kernel(nlayers),
        out_shape=jax.ShapeDtypeStruct((g_pad, OUT_W), jnp.float32),
        grid_spec=pltpu.PrefetchScalarGridSpec(
            num_scalar_prefetch=0, grid=(n_pad // tile_p,),
            in_specs=in_specs, out_specs=out_specs, scratch_shapes=scratch),
        compiler_params=pltpu.CompilerParams(
            dimension_semantics=("arbitrary",), vmem_limit_bytes=vmem),
    )(*operands)


# --------------------------------------------------------------------------- #
# Parameters: BN folded into the Linears, all dims zero-padded to 128 lanes,
# MXU weights stored in bf16.  Zero padding is exact (ReLU(0)=0 propagates).
# --------------------------------------------------------------------------- #
def init_params(key, num_features, hidden, num_classes, nlayers):
    assert num_classes <= HEAD_HALF
    f_pad = _round_up(num_features, LANE)
    h_pad = _round_up(hidden, LANE)
    keys = iter(jax.random.split(key, 64))

    def lin(fan_in, fan_out):
        k1, k2 = jax.random.split(next(keys))
        bound = 1.0 / math.sqrt(fan_in)
        w = jax.random.uniform(k1, (fan_in, fan_out), jnp.float32, -bound, bound)
        b = jax.random.uniform(k2, (1, fan_out), jnp.float32, -bound, bound)
        return w, b

    def pad2(w, r, c):
        return jnp.zeros((r, c), jnp.float32).at[:w.shape[0], :w.shape[1]].set(w)

    # eval-mode BN with fresh running stats (mean=0, var=1, affine identity)
    # -> pure scale 1/sqrt(1+eps), folded into the preceding Linear.
    bn_s = 1.0 / math.sqrt(1.0 + BN_EPS)

    convs = []
    fi, fi_pad = num_features, f_pad
    for _ in range(nlayers):
        w1, b1 = lin(fi, hidden)
        w2, b2 = lin(hidden, hidden)
        convs.append({
            'eps': jnp.zeros((1,), jnp.float32),                 # train_eps=True, init 0
            'w1': pad2(w1 * bn_s, fi_pad, h_pad).astype(jnp.bfloat16),
            'b1': pad2(b1 * bn_s, 1, h_pad),
            'w2': pad2(w2 * bn_s, h_pad, h_pad).astype(jnp.bfloat16),
            'b2': pad2(b2 * bn_s, 1, h_pad),
        })
        fi, fi_pad = hidden, h_pad

    lw, lb = lin(nlayers * hidden, hidden)
    lw = lw.reshape(nlayers, hidden, hidden)
    lin1_w = jnp.zeros((nlayers, h_pad, h_pad), jnp.float32).at[:, :hidden, :hidden].set(lw)

    p = {'convs': convs, 'f_pad': f_pad, 'h_pad': h_pad,
         'lin1_w': lin1_w.astype(jnp.bfloat16),
         'lin1_b': pad2(lb, 1, h_pad)}

    gw, gb = lin(hidden, 1)
    p['gate_w'] = pad2(gw.T, 1, h_pad)                          # stored transposed (1, H)
    p['gate_b'] = gb                                            # (1, 1)

    # fused prediction heads: label head in lanes [0:64), env head in [64:128)
    p1w, p1b = lin(hidden, hidden)
    p2w, p2b = lin(hidden, num_classes)
    e1w, e1b = lin(hidden, hidden)
    e2w, e2b = lin(hidden, num_classes)
    hw1 = jnp.zeros((h_pad, 2 * h_pad), jnp.float32)
    hw1 = hw1.at[:hidden, :hidden].set(p1w).at[:hidden, h_pad:h_pad + hidden].set(e1w)
    hb1 = jnp.zeros((1, 2 * h_pad), jnp.float32)
    hb1 = hb1.at[:, :hidden].set(p1b).at[:, h_pad:h_pad + hidden].set(e1b)
    hw2 = jnp.zeros((2 * h_pad, OUT_W), jnp.float32)
    hw2 = hw2.at[:hidden, :num_classes].set(p2w)
    hw2 = hw2.at[h_pad:h_pad + hidden, HEAD_HALF:HEAD_HALF + num_classes].set(e2w)
    hb2 = jnp.zeros((1, OUT_W), jnp.float32)
    hb2 = hb2.at[:, :num_classes].set(p2b)
    hb2 = hb2.at[:, HEAD_HALF:HEAD_HALF + num_classes].set(e2b)
    p['hw1'] = hw1.astype(jnp.bfloat16)
    p['hb1'] = hb1
    p['hw2'] = hw2.astype(jnp.bfloat16)
    p['hb2'] = hb2
    return p


# --------------------------------------------------------------------------- #
# Forward pass (dropout=0.0 in the reference -> no-op).
# --------------------------------------------------------------------------- #
def gin2_forward(x, edge_index, batch_ids, params, *, num_features, num_graphs,
                 num_classes):
    n = x.shape[0]
    f_pad = params['f_pad']
    n_pad = max(256, _round_up(n, 256))
    g_pad = max(8, _round_up(num_graphs, 8))

    x = x[:, :num_features].astype(jnp.float32)                  # x = x[:, :num_features]
    x_p = jnp.zeros((n_pad, f_pad), jnp.float32).at[:n, :num_features].set(x)

    # dense adjacency (dst, src) built directly in bf16 (exact for small edge counts)
    # TODO(synk): for large sparse graphs, skip dense A and gather via scalar-prefetched CSR.
    src, dst = edge_index[0], edge_index[1]
    a = jnp.zeros((n_pad, n_pad), jnp.bfloat16).at[dst, src].add(1.0)

    # graph membership mask, transposed (G, N), bf16 (padded nodes -> no graph)
    bid = jnp.full((n_pad,), -1, jnp.int32).at[:n].set(batch_ids.astype(jnp.int32))
    mt_t = (jnp.arange(g_pad, dtype=jnp.int32)[:, None] == bid[None, :]).astype(jnp.bfloat16)

    h = x_p
    xs = []
    for layer_p in params['convs']:
        h = gin_conv_layer(h, a, layer_p)
        xs.append(h)                                             # no jnp.stack copy

    out = pool_and_heads(xs, mt_t, params, g_pad=g_pad)          # (g_pad, 128)
    h_label = out[:num_graphs, :num_classes]
    h_env = out[:num_graphs, HEAD_HALF:HEAD_HALF + num_classes]
    return h_label, h_env


if __name__ == "__main__":
    num_features, hidden, num_classes, nlayers = 16, 32, 2, 3
    n_nodes, num_graphs = 12, 2

    key = jax.random.PRNGKey(0)
    kx, kp = jax.random.split(key)

    # node features for 2 small graphs (7 + 5 nodes)
    x = jax.random.normal(kx, (n_nodes, num_features), jnp.float32)

    # bidirectional ring edges within each graph
    g0 = [(i, (i + 1) % 7) for i in range(7)]
    g1 = [(7 + i, 7 + (i + 1) % 5) for i in range(5)]
    edges = g0 + [(b, a) for a, b in g0] + g1 + [(b, a) for a, b in g1]
    edge_index = jnp.array(edges, dtype=jnp.int32).T             # (2, 24)
    batch_ids = jnp.array([0] * 7 + [1] * 5, dtype=jnp.int32)

    params = init_params(kp, num_features, hidden, num_classes, nlayers)

    h_label, h_env = gin2_forward(
        x, edge_index, batch_ids, params,
        num_features=num_features, num_graphs=num_graphs, num_classes=num_classes)
    jax.block_until_ready((h_label, h_env))

    assert h_label.shape == (num_graphs, num_classes)
    assert h_env.shape == (num_graphs, num_classes)
    assert bool(jnp.all(jnp.isfinite(h_label))) and bool(jnp.all(jnp.isfinite(h_env)))
    print("KERNEL_OK")
</pallas_src>

<mosaic_0001>
module attributes {stable_mosaic.version = 11 : i64} {
  func.func @gin_conv_kernel(%arg0: i32, %arg1: i32, %arg2: memref<1xf32, #tpu.memory_space<smem>>, %arg3: memref<256x128xbf16, #tpu.memory_space<vmem>>, %arg4: memref<256x128xf32, #tpu.memory_space<vmem>>, %arg5: memref<256x256xbf16, #tpu.memory_space<vmem>>, %arg6: memref<128x128xbf16, #tpu.memory_space<vmem>>, %arg7: memref<1x128xf32, #tpu.memory_space<vmem>>, %arg8: memref<128x128xbf16, #tpu.memory_space<vmem>>, %arg9: memref<1x128xf32, #tpu.memory_space<vmem>>, %arg10: memref<256x128xf32, #tpu.memory_space<vmem>>, %arg11: memref<256x128xf32, #tpu.memory_space<vmem>>) attributes {dimension_semantics = [#tpu.dimension_semantics<parallel>, #tpu.dimension_semantics<arbitrary>], iteration_bounds = array<i64: 1, 1>, scalar_prefetch = 1 : i64, scratch_operands = 1 : i64, tpu.core_type = #tpu.core_type<tc>, window_params = [{transform_indices = @transform_0, window_bounds = array<i64: 256, 128>}, {transform_indices = @transform_1, window_bounds = array<i64: 256, 128>}, {transform_indices = @transform_2, window_bounds = array<i64: 256, 256>}, {pipeline_mode = #tpu.pipeline_mode<synchronous>, transform_indices = @transform_3, window_bounds = array<i64: 128, 128>}, {pipeline_mode = #tpu.pipeline_mode<synchronous>, transform_indices = @transform_4, window_bounds = array<i64: 1, 128>}, {pipeline_mode = #tpu.pipeline_mode<synchronous>, transform_indices = @transform_5, window_bounds = array<i64: 128, 128>}, {pipeline_mode = #tpu.pipeline_mode<synchronous>, transform_indices = @transform_6, window_bounds = array<i64: 1, 128>}, {transform_indices = @transform_7, window_bounds = array<i64: 256, 128>}]} {
    %c0_i32 = arith.constant 0 : i32
    %0 = arith.cmpi eq, %arg1, %c0_i32 : i32
    %1 = arith.extui %0 : i1 to i32
    %c0_i32_0 = arith.constant 0 : i32
    %2 = arith.cmpi ne, %1, %c0_i32_0 : i32
    scf.if %2 {
      %c0_10 = arith.constant 0 : index
      %12 = memref.load %arg2[%c0_10] : memref<1xf32, #tpu.memory_space<smem>>
      %cst_11 = arith.constant 1.000000e+00 : f32
      %13 = arith.addf %cst_11, %12 : f32
      %c0_12 = arith.constant 0 : index
      %c0_13 = arith.constant 0 : index
      %14 = vector.load %arg4[%c0_12, %c0_13] : memref<256x128xf32, #tpu.memory_space<vmem>>, vector<256x128xf32>
      %15 = vector.broadcast %13 : f32 to vector<256x128xf32>
      %16 = arith.mulf %15, %14 : vector<256x128xf32>
      %c0_14 = arith.constant 0 : index
      %c0_15 = arith.constant 0 : index
      %17 = vector.load %arg11[%c0_14, %c0_15] : memref<256x128xf32, #tpu.memory_space<vmem>>, vector<256x128xf32>
      tpu.vector_store %arg11[%c0_14, %c0_15], %16 {strides = array<i32>} : memref<256x128xf32, #tpu.memory_space<vmem>>, vector<256x128xf32>,
    } else {
    }
    %c0 = arith.constant 0 : index
    %c0_1 = arith.constant 0 : index
    %3 = vector.load %arg11[%c0, %c0_1] : memref<256x128xf32, #tpu.memory_space<vmem>>, vector<256x128xf32>
    %c0_2 = arith.constant 0 : index
    %c0_3 = arith.constant 0 : index
    %4 = vector.load %arg5[%c0_2, %c0_3] : memref<256x256xbf16, #tpu.memory_space<vmem>>, vector<256x256xbf16>
    %c0_4 = arith.constant 0 : index
    %c0_5 = arith.constant 0 : index
    %5 = vector.load %arg3[%c0_4, %c0_5] : memref<256x128xbf16, #tpu.memory_space<vmem>>, vector<256x128xbf16>
    %cst = arith.constant dense<0.000000e+00> : vector<256x128xf32>
    %6 = tpu.matmul %4, %5, %cst {dimension_numbers = #tpu.dot_dimension_numbers<[1], [0], [0], [1], [0, 0, 1, 1], [], []>} : vector<256x256xbf16>, vector<256x128xbf16>, vector<256x128xf32> -> vector<256x128xf32>
    %7 = arith.addf %3, %6 : vector<256x128xf32>
    %c0_6 = arith.constant 0 : index
    %c0_7 = arith.constant 0 : index
    %8 = vector.load %arg11[%c0_6, %c0_7] : memref<256x128xf32, #tpu.memory_space<vmem>>, vector<256x128xf32>
    tpu.vector_store %arg11[%c0_6, %c0_7], %7 {strides = array<i32>} : memref<256x128xf32, #tpu.memory_space<vmem>>, vector<256x128xf32>,
    %c0_i32_8 = arith.constant 0 : i32
    %9 = arith.cmpi eq, %arg1, %c0_i32_8 : i32
    %10 = arith.extui %9 : i1 to i32
    %c0_i32_9 = arith.constant 0 : i32
    %11 = arith.cmpi ne, %10, %c0_i32_9 : i32
    scf.if %11 {
      %c0_10 = arith.constant 0 : index
      %c0_11 = arith.constant 0 : index
      %12 = vector.load %arg11[%c0_10, %c0_11] : memref<256x128xf32, #tpu.memory_space<vmem>>, vector<256x128xf32>
      %13 = arith.truncf %12 : vector<256x128xf32> to vector<256x128xbf16>
      %c0_12 = arith.constant 0 : index
      %c0_13 = arith.constant 0 : index
      %14 = vector.load %arg6[%c0_12, %c0_13] : memref<128x128xbf16, #tpu.memory_space<vmem>>, vector<128x128xbf16>
      %cst_14 = arith.constant dense<0.000000e+00> : vector<256x128xf32>
      %15 = tpu.matmul %13, %14, %cst_14 {dimension_numbers = #tpu.dot_dimension_numbers<[1], [0], [0], [1], [0, 0, 1, 1], [], []>} : vector<256x128xbf16>, vector<128x128xbf16>, vector<256x128xf32> -> vector<256x128xf32>
      %c0_15 = arith.constant 0 : index
      %c0_16 = arith.constant 0 : index
      %16 = vector.load %arg7[%c0_15, %c0_16] : memref<1x128xf32, #tpu.memory_space<vmem>>, vector<1x128xf32>
      %17 = vector.broadcast %16 : vector<1x128xf32> to vector<256x128xf32>
      %18 = arith.addf %15, %17 : vector<256x128xf32>
      %cst_17 = arith.constant 0.000000e+00 : f32
      %19 = vector.broadcast %cst_17 : f32 to vector<256x128xf32>
      %20 = arith.maximumf %18, %19 : vector<256x128xf32>
      %21 = arith.truncf %20 : vector<256x128xf32> to vector<256x128xbf16>
      %c0_18 = arith.constant 0 : index
      %c0_19 = arith.constant 0 : index
      %22 = vector.load %arg8[%c0_18, %c0_19] : memref<128x128xbf16, #tpu.memory_space<vmem>>, vector<128x128xbf16>
      %cst_20 = arith.constant dense<0.000000e+00> : vector<256x128xf32>
      %23 = tpu.matmul %21, %22, %cst_20 {dimension_numbers = #tpu.dot_dimension_numbers<[1], [0], [0], [1], [0, 0, 1, 1], [], []>} : vector<256x128xbf16>, vector<128x128xbf16>, vector<256x128xf32> -> vector<256x128xf32>
      %c0_21 = arith.constant 0 : index
      %c0_22 = arith.constant 0 : index
      %24 = vector.load %arg9[%c0_21, %c0_22] : memref<1x128xf32, #tpu.memory_space<vmem>>, vector<1x128xf32>
      %25 = vector.broadcast %24 : vector<1x128xf32> to vector<256x128xf32>
      %26 = arith.addf %23, %25 : vector<256x128xf32>
      %cst_23 = arith.constant 0.000000e+00 : f32
      %27 = vector.broadcast %cst_23 : f32 to vector<256x128xf32>
      %28 = arith.maximumf %26, %27 : vector<256x128xf32>
      %c0_24 = arith.constant 0 : index
      %c0_25 = arith.constant 0 : index
      %29 = vector.load %arg10[%c0_24, %c0_25] : memref<256x128xf32, #tpu.memory_space<vmem>>, vector<256x128xf32>
      tpu.vector_store %arg10[%c0_24, %c0_25], %28 {strides = array<i32>} : memref<256x128xf32, #tpu.memory_space<vmem>>, vector<256x128xf32>,
    } else {
    }
    return
  }
  func.func @transform_0(%arg0: i32, %arg1: i32, %arg2: memref<1xf32, #tpu.memory_space<smem>>) -> (i32, i32) {
    %c0_i32 = arith.constant 0 : i32
    %c0_i32_0 = arith.constant 0 : i32
    return %arg1, %c0_i32 : i32, i32
  }
  func.func @transform_1(%arg0: i32, %arg1: i32, %arg2: memref<1xf32, #tpu.memory_space<smem>>) -> (i32, i32) {
    %c0_i32 = arith.constant 0 : i32
    %c0_i32_0 = arith.constant 0 : i32
    return %arg0, %c0_i32 : i32, i32
  }
  func.func @transform_2(%arg0: i32, %arg1: i32, %arg2: memref<1xf32, #tpu.memory_space<smem>>) -> (i32, i32) {
    %c0_i32 = arith.constant 0 : i32
    return %arg0, %arg1 : i32, i32
  }
  func.func @transform_3(%arg0: i32, %arg1: i32, %arg2: memref<1xf32, #tpu.memory_space<smem>>) -> (i32, i32) {
    %c0_i32 = arith.constant 0 : i32
    %c0_i32_0 = arith.constant 0 : i32
    %c0_i32_1 = arith.constant 0 : i32
    return %c0_i32, %c0_i32_0 : i32, i32
  }
  func.func @transform_4(%arg0: i32, %arg1: i32, %arg2: memref<1xf32, #tpu.memory_space<smem>>) -> (i32, i32) {
    %c0_i32 = arith.constant 0 : i32
    %c0_i32_0 = arith.constant 0 : i32
    %c0_i32_1 = arith.constant 0 : i32
    return %c0_i32, %c0_i32_0 : i32, i32
  }
  func.func @transform_5(%arg0: i32, %arg1: i32, %arg2: memref<1xf32, #tpu.memory_space<smem>>) -> (i32, i32) {
    %c0_i32 = arith.constant 0 : i32
    %c0_i32_0 = arith.constant 0 : i32
    %c0_i32_1 = arith.constant 0 : i32
    return %c0_i32, %c0_i32_0 : i32, i32
  }
  func.func @transform_6(%arg0: i32, %arg1: i32, %arg2: memref<1xf32, #tpu.memory_space<smem>>) -> (i32, i32) {
    %c0_i32 = arith.constant 0 : i32
    %c0_i32_0 = arith.constant 0 : i32
    %c0_i32_1 = arith.constant 0 : i32
    return %c0_i32, %c0_i32_0 : i32, i32
  }
  func.func @transform_7(%arg0: i32, %arg1: i32, %arg2: memref<1xf32, #tpu.memory_space<smem>>) -> (i32, i32) {
    %c0_i32 = arith.constant 0 : i32
    %c0_i32_0 = arith.constant 0 : i32
    return %arg0, %c0_i32 : i32, i32
  }
}

</mosaic_0001>

<bundles_post_ra>
// kernel: tpu_custom_call.1
= control target key start
LH: loop header
LB: loop body
LE: loop exit
PB: predicated region body
PF: predicated region fallthrough
CT: control target
= control target key end

     0   :  { %14 = vsyncpa [#allocation6], 0  ;;  %s1979_s0 = inlined_call_operand.<no memory space> [shape: f32[1], index: 0, kind: input, shape index: {}]   ;;  %s1980_s1 = inlined_call_operand.hbm [shape: bf16[256,128], index: 1, kind: input, shape index: {}]   ;;  %s1981_s2 = inlined_call_operand.hbm [shape: f32[256,128], index: 2, kind: input, shape index: {}]   ;;  %s1982_s3 = inlined_call_operand.hbm [shape: bf16[256,256], index: 3, kind: input, shape index: {}]   ;;  %s1983_s4 = inlined_call_operand.hbm [shape: bf16[128,128], index: 4, kind: input, shape index: {}]   ;;  %s1984_s5 = inlined_call_operand.vmem [shape: f32[1,128], index: 5, kind: input, shape index: {}]   ;;  %s1985_s6 = inlined_call_operand.hbm [shape: bf16[128,128], index: 6, kind: input, shape index: {}]   ;;  %s1986_s7 = inlined_call_operand.vmem [shape: f32[1,128], index: 7, kind: input, shape index: {}]   ;;  %s1987_s8 = inlined_call_operand.hbm [shape: f32[256,128], index: 8, kind: output, shape index: {}]  }
   0x1   :  { %15 = vsyncpa [#allocation9], 0 }
   0x2   :  { %16 = vsyncpa [#allocation12], 0  ;;  %s35_s29 = sshll.u32 %s1981_s2, 4  ;;  %s36_s29 = int_to_ptr.hbm [resolvable:$true] %s35_s29 }
   0x3   :  { %17 = vsyncpa [#allocation7], 0  ;;  %s1786_s30 = smov [#allocation8]   ;;  %s1787_s10 = smov 128  }
   0x4   :  { %s37_s9 = sshll.u32 %s1786_s30, 4  ;;  %s1788_s11 = smov 8   ;;  %s38_s9 = int_to_ptr.vmem [resolvable:$true] %s37_s9 }
   0x5   :  { %43 = dma.hbm_to_vmem [thread:$0]  %s36_s29, 4096, %s38_s9, [#allocation9], %s1787_s10, %s1787_s10, %s1788_s11  }
   0x6   :  { %s61_s14 = sshll.u32 %s1983_s4, 4  ;;  %s1789_s15 = smov [#allocation11]   ;;  %s62_s14 = int_to_ptr.hbm [resolvable:$true] %s61_s14 }
   0x7   :  { %s63_s16 = sshll.u32 %s1789_s15, 4  ;;  %s22_s18 = sshll.u32 %s1980_s1, 4  ;;  %s64_s16 = int_to_ptr.vmem [resolvable:$true] %s63_s16  ;;  %s23_s18 = int_to_ptr.hbm [resolvable:$true] %s22_s18 }
   0x8   :  { %s1790_s19 = smov 64   ;;  %s1791_s20 = smov 4  }
   0x9   :  { %69 = dma.hbm_to_vmem [thread:$0]  %s62_s14, 1024, %s64_s16, [#allocation12], %s1790_s19, %s1790_s19, %s1791_s20  }
   0xa   :  { %s48_s23 = sshll.u32 %s1982_s3, 4  ;;  %s1792_s24 = smov [#allocation5]   ;;  %s49_s23 = int_to_ptr.hbm [resolvable:$true] %s48_s23 }
   0xb   :  { %s24_s25 = sshll.u32 %s1792_s24, 4  ;;  %s1793_s4 = smov [#allocation10]   ;;  %s25_s25 = int_to_ptr.vmem [resolvable:$true] %s24_s25 }
   0xc   :  { %30 = dma.hbm_to_vmem [thread:$0]  %s23_s18, 2048, %s25_s25, [#allocation6], %s1790_s19, %s1790_s19, %s1791_s20  }
   0xd   :  { %s50_s26 = sshll.u32 %s1793_s4, 4  ;;  %s76_s1 = sshll.u32 %s1985_s6, 4  ;;  %s51_s26 = int_to_ptr.vmem [resolvable:$true] %s50_s26  ;;  %s77_s1 = int_to_ptr.hbm [resolvable:$true] %s76_s1 }
   0xe   :  { %56 = dma.hbm_to_vmem [thread:$0]  %s49_s23, 4096, %s51_s26, [#allocation9], %s1787_s10, %s1787_s10, %s1788_s11  }
   0xf   :  { %s1794_s29 = smov [#allocation13]  }
  0x10   :  { %s78_s30 = sshll.u32 %s1794_s29, 4  ;;  %s79_s30 = int_to_ptr.vmem [resolvable:$true] %s78_s30 }
  0x11   :  { %84 = dma.hbm_to_vmem [thread:$0]  %s77_s1, 1024, %s79_s30, [#allocation12], %s1790_s19, %s1790_s19, %s1791_s20  }
  0x12   :  { %1778 = dma.done.wait [#allocation6], 2048  }
  0x13   :  { %1779 = vsyncadd [#allocation6], 4294965248 }
  0x14   :  { %1780 = dma.done.wait [#allocation9], 8192  }
  0x15   :  { %1781 = vsyncadd [#allocation9], 4294959104 }
  0x16   :  { %1782 = dma.done.wait [#allocation12], 2048  }
  0x17   :  { %1783 = vsyncadd [#allocation12], 4294965248  ;;  %v1597_v0 = vld [vmem:[#allocation5 + $0x38] sm:$0xff]  ;;  %v1596_v2 = vld [vmem:[#allocation5 + $0x30] sm:$0xff]  ;;  %s112_s9 = sadd.f32 1.0, %s1979_s0  ;;  %s1287_s17 = sshll.u32 %s1987_s8, 4  ;;  %s1288_s17 = int_to_ptr.hbm [resolvable:$true] %s1287_s17 }
  0x18   :  { %v1605_v1 = vld [vmem:[#allocation5 + $0x78] sm:$0xff]  ;;  %562 = vmatpush.bf16.msra.mxu0 %v1597_v0  ;;  %v1604_v3 = vld [vmem:[#allocation5 + $0x70] sm:$0xff]  ;;  %v1595_v4 = vld [vmem:[#allocation5 + $0x28] sm:$0xff] }
  0x19   :  { %651 = vmatpush.bf16.msra.mxu1 %v1605_v1  ;;  %v1603_v5 = vld [vmem:[#allocation5 + $0x68] sm:$0xff]  ;;  %v1594_v6 = vld [vmem:[#allocation5 + $0x20] sm:$0xff]  ;;  %v1593_v8 = vld [vmem:[#allocation5 + $0x18] sm:$0xff] }
  0x1a   :  { %v1602_v7 = vld [vmem:[#allocation5 + $0x60] sm:$0xff]  ;;  %v1601_v9 = vld [vmem:[#allocation5 + $0x58] sm:$0xff]  ;;  %v1592_v10 = vld [vmem:[#allocation5 + $0x10] sm:$0xff] }
  0x1b   :  { %v1600_v11 = vld [vmem:[#allocation5 + $0x50] sm:$0xff]  ;;  %v1591_v12 = vld [vmem:[#allocation5 + $0x8] sm:$0xff]  ;;  %v1590_v14 = vld [vmem:[#allocation5] sm:$0xff] }
  0x1c   :  { %563 = vmatpush.bf16.msra.mxu0 %v1596_v2  ;;  %v1599_v13 = vld [vmem:[#allocation5 + $0x48] sm:$0xff]  ;;  %v1598_v15 = vld [vmem:[#allocation5 + $0x40] sm:$0xff]  ;;  %v1312_v22 = vld [vmem:[#allocation10 + $0x10] sm:$0xf] }
  0x1d   :  { %652 = vmatpush.bf16.msra.mxu1 %v1604_v3  ;;  %v1304_v16 = vld [vmem:[#allocation10] sm:$0xf]  ;;  %v1559_v17 = vld [vmem:[#allocation10 + $0x4] sm:$0xf0]  ;;  %v1558_v18 = vld [vmem:[#allocation10 + $0x4] sm:$0xf] }
  0x1e   :  { %v1306_v19 = vld [vmem:[#allocation10 + $0x8] sm:$0xf0]  ;;  %v1305_v20 = vor.u32 %v1559_v17, %v1304_v16  ;;  %v1561_v23 = vld [vmem:[#allocation10 + $0x14] sm:$0xf0]  ;;  %v1560_v24 = vld [vmem:[#allocation10 + $0x14] sm:$0xf]  ;;  %v1865_v17 = vstv %s112_s9 }
  0x1f   :  { %v1309_v21 = vor.u32 %v1558_v18, %v1306_v19  ;;  %v1314_v25 = vld [vmem:[#allocation10 + $0x18] sm:$0xf0]  ;;  %v1313_v26 = vor.u32 %v1561_v23, %v1312_v22  ;;  %v1320_v28 = vld [vmem:[#allocation10 + $0x20] sm:$0xf]  ;;  %v1563_v29 = vld [vmem:[#allocation10 + $0x24] sm:$0xf0] }
  0x20   :  { %564 = vmatpush.bf16.msra.mxu0 %v1595_v4  ;;  %v1317_v27 = vor.u32 %v1560_v24, %v1314_v25  ;;  %v1562_v30 = vld [vmem:[#allocation10 + $0x24] sm:$0xf]  ;;  %v1322_v31 = vld [vmem:[#allocation10 + $0x28] sm:$0xf0]  ;;  %v1321_v32 = vor.u32 %v1563_v29, %v1320_v28  ;;  %v1328_v34 = vld [vmem:[#allocation10 + $0x30] sm:$0xf] }
  0x21   :  { %653 = vmatpush.bf16.msra.mxu1 %v1603_v5  ;;  %v1325_v33 = vor.u32 %v1562_v30, %v1322_v31  ;;  %v1565_v35 = vld [vmem:[#allocation10 + $0x34] sm:$0xf0]  ;;  %v1564_v36 = vld [vmem:[#allocation10 + $0x34] sm:$0xf]  ;;  %v1330_v37 = vld [vmem:[#allocation10 + $0x38] sm:$0xf0] }
  0x22   :  { %v1329_v38 = vor.u32 %v1565_v35, %v1328_v34  ;;  %v1333_v39 = vor.u32 %v1564_v36, %v1330_v37  ;;  %v1336_v40 = vld [vmem:[#allocation10 + $0x40] sm:$0xf]  ;;  %v1567_v41 = vld [vmem:[#allocation10 + $0x44] sm:$0xf0]  ;;  %v1566_v42 = vld [vmem:[#allocation10 + $0x44] sm:$0xf] }
  0x23   :  { %v1338_v43 = vld [vmem:[#allocation10 + $0x48] sm:$0xf0]  ;;  %v1337_v44 = vor.u32 %v1567_v41, %v1336_v40  ;;  %v1613_v46 = vld [vmem:[#allocation11 + $0x38] sm:$0xff]  ;;  %v1344_v47 = vld [vmem:[#allocation10 + $0x50] sm:$0xf] }
  0x24   :  { %565 = vmatpush.bf16.msra.mxu0 %v1594_v6  ;;  %v1341_v45 = vor.u32 %v1566_v42, %v1338_v43  ;;  %923 = vmatpush.bf16.msra.mxu2 %v1613_v46  ;;  %v1569_v48 = vld [vmem:[#allocation10 + $0x54] sm:$0xf0]  ;;  %v1568_v49 = vld [vmem:[#allocation10 + $0x54] sm:$0xf]  ;;  %v1346_v50 = vld [vmem:[#allocation10 + $0x58] sm:$0xf0] }
  0x25   :  { %654 = vmatpush.bf16.msra.mxu1 %v1602_v7  ;;  %v1345_v51 = vor.u32 %v1569_v48, %v1344_v47  ;;  %v1349_v52 = vor.u32 %v1568_v49, %v1346_v50  ;;  %v1612_v53 = vld [vmem:[#allocation11 + $0x30] sm:$0xff]  ;;  %v1611_v54 = vld [vmem:[#allocation11 + $0x28] sm:$0xff]  ;;  %v1610_v55 = vld [vmem:[#allocation11 + $0x20] sm:$0xff] }
  0x26   :  { %v1352_v56 = vld [vmem:[#allocation10 + $0x60] sm:$0xf]  ;;  %v1571_v57 = vld [vmem:[#allocation10 + $0x64] sm:$0xf0]  ;;  %v1570_v58 = vld [vmem:[#allocation10 + $0x64] sm:$0xf] }
  0x27   :  { %v1354_v59 = vld [vmem:[#allocation10 + $0x68] sm:$0xf0]  ;;  %v1609_v60 = vld [vmem:[#allocation11 + $0x18] sm:$0xff]  ;;  %v1353_v61 = vor.u32 %v1571_v57, %v1352_v56  ;;  %v1608_v63 = vld [vmem:[#allocation11 + $0x10] sm:$0xff] }
  0x28   :  { %566 = vmatpush.bf16.msra.mxu0 %v1593_v8  ;;  %924 = vmatpush.bf16.msra.mxu2 %v1612_v53  ;;  %v1357_v62 = vor.u32 %v1570_v58, %v1354_v59  ;;  %v1607_v0 = vld [vmem:[#allocation11 + $0x8] sm:$0xff]  ;;  %v1606_v1 = vld [vmem:[#allocation11] sm:$0xff]  ;;  %v1360_v2 = vld [vmem:[#allocation10 + $0x70] sm:$0xf] }
  0x29   :  { %655 = vmatpush.bf16.msra.mxu1 %v1601_v9  ;;  %v1573_v3 = vld [vmem:[#allocation10 + $0x74] sm:$0xf0]  ;;  %v1572_v4 = vld [vmem:[#allocation10 + $0x74] sm:$0xf]  ;;  %v1362_v5 = vld [vmem:[#allocation10 + $0x78] sm:$0xf0] }
  0x2a   :  { %v1361_v6 = vor.u32 %v1573_v3, %v1360_v2  ;;  %v1365_v7 = vor.u32 %v1572_v4, %v1362_v5  ;;  %v1368_v8 = vld [vmem:[#allocation10 + $0x80] sm:$0xf]  ;;  %v1575_v9 = vld [vmem:[#allocation10 + $0x84] sm:$0xf0]  ;;  %v1577_v28 = vld [vmem:[#allocation10 + $0x94] sm:$0xf0] }
  0x2b   :  { %v113_v16 = vld [vmem:[#allocation8] sm:$0xff]  ;;  %v114_v18 = vld [vmem:[#allocation8 + $0x8] sm:$0xff]  ;;  %v1576_v29 = vld [vmem:[#allocation10 + $0x94] sm:$0xf] }
  0x2c   :  { %567 = vmatpush.bf16.msra.mxu0 %v1592_v10  ;;  %925 = vmatpush.bf16.msra.mxu2 %v1611_v54  ;;  %v1574_v10 = vld [vmem:[#allocation10 + $0x84] sm:$0xf]  ;;  %v146_v19 = vmul.f32 %v1865_v17, %v113_v16  ;;  %v1378_v30 = vld [vmem:[#allocation10 + $0x98] sm:$0xf0]  ;;  %v115_v36 = vld [vmem:[#allocation8 + $0x10] sm:$0xff] }
  0x2d   :  { %656 = vmatpush.bf16.msra.mxu1 %v1600_v11  ;;  %v1370_v11 = vld [vmem:[#allocation10 + $0x88] sm:$0xf0]  ;;  %v116_v37 = vld [vmem:[#allocation8 + $0x18] sm:$0xff]  ;;  %v1384_v46 = vld [vmem:[#allocation10 + $0xa0] sm:$0xf] }
  0x2e   :  { %v149_v40 = vmul.f32 %v1865_v17, %v116_v37  ;;  %v1579_v47 = vld [vmem:[#allocation10 + $0xa4] sm:$0xf0]  ;;  %v1578_v48 = vld [vmem:[#allocation10 + $0xa4] sm:$0xf]  ;;  %v1386_v49 = vld [vmem:[#allocation10 + $0xa8] sm:$0xf0] }
  0x2f   :  { %v118_v56 = vld [vmem:[#allocation8 + $0x28] sm:$0xff]  ;;  %v1581_v2 = vld [vmem:[#allocation10 + $0xb4] sm:$0xf0]  ;;  %v1580_v3 = vld [vmem:[#allocation10 + $0xb4] sm:$0xf] }
  0x30   :  { %568 = vmatpush.bf16.msra.mxu0 %v1591_v12  ;;  %926 = vmatpush.bf16.msra.mxu2 %v1610_v55  ;;  %v1369_v12 = vor.u32 %v1575_v9, %v1368_v8  ;;  %v117_v55 = vld [vmem:[#allocation8 + $0x20] sm:$0xff]  ;;  %v151_v59 = vmul.f32 %v1865_v17, %v118_v56  ;;  %v1394_v4 = vld [vmem:[#allocation10 + $0xb8] sm:$0xf0] }
  0x31   :  { %657 = vmatpush.bf16.msra.mxu1 %v1599_v13  ;;  %v1373_v13 = vor.u32 %v1574_v10, %v1370_v11  ;;  %v150_v57 = vmul.f32 %v1865_v17, %v117_v55  ;;  %v119_v10 = vld [vmem:[#allocation8 + $0x30] sm:$0xff]  ;;  %v120_v11 = vld [vmem:[#allocation8 + $0x38] sm:$0xff] }
  0x34   :  { %569 = vmatpush.bf16.msra.mxu0 %v1590_v14  ;;  %927 = vmatpush.bf16.msra.mxu2 %v1609_v60 }
  0x35   :  { %658 = vmatpush.bf16.msra.mxu1 %v1598_v15 }
  0x37   :  { %570 = vmatmul.bf16.vlgmr.msra.gmra.mxu0 %v1305_v20 }
  0x38   :  { %659 = vmatmul.bf16.vlgmr.msra.gmra.mxu1 %v1309_v21  ;;  %928 = vmatpush.bf16.msra.mxu2 %v1608_v63  ;;  %v147_v21 = vmul.f32 %v1865_v17, %v114_v18 }
  0x3c   :  { %929 = vmatpush.bf16.msra.mxu2 %v1607_v0 }
  0x40   :  { %930 = vmatpush.bf16.msra.mxu2 %v1606_v1  ;;  %v1392_v1 = vld [vmem:[#allocation10 + $0xb0] sm:$0xf] }
  0x47   :  { %575 = vmatmul.bf16.gmra.mxu0 %v1313_v26 }
  0x48   :  { %664 = vmatmul.bf16.gmra.mxu1 %v1317_v27  ;;  %v1376_v27 = vld [vmem:[#allocation10 + $0x90] sm:$0xf] }
  0x57   :  { %580 = vmatmul.bf16.gmra.mxu0 %v1321_v32  ;;  %v1377_v32 = vor.u32 %v1577_v28, %v1376_v27 }
  0x58   :  { %669 = vmatmul.bf16.gmra.mxu1 %v1325_v33  ;;  %v1381_v33 = vor.u32 %v1576_v29, %v1378_v30  ;;  %v121_v30 = vld [vmem:[#allocation8 + $0x40] sm:$0xff] }
  0x67   :  { %585 = vmatmul.bf16.gmra.mxu0 %v1329_v38  ;;  %v148_v38 = vmul.f32 %v1865_v17, %v115_v36 }
  0x68   :  { %674 = vmatmul.bf16.gmra.mxu1 %v1333_v39 }
  0x77   :  { %590 = vmatmul.bf16.gmra.mxu0 %v1337_v44 }
  0x78   :  { %679 = vmatmul.bf16.gmra.mxu1 %v1341_v45 }
  0x87   :  { %595 = vmatmul.bf16.gmra.mxu0 %v1345_v51  ;;  %v1385_v51 = vor.u32 %v1579_v47, %v1384_v46 }
  0x88   :  { %684 = vmatmul.bf16.gmra.mxu1 %v1349_v52  ;;  %v1389_v52 = vor.u32 %v1578_v48, %v1386_v49  ;;  %v123_v49 = vld [vmem:[#allocation8 + $0x50] sm:$0xff] }
  0x97   :  { %600 = vmatmul.bf16.gmra.mxu0 %v1353_v61 }
  0x98   :  { %689 = vmatmul.bf16.gmra.mxu1 %v1357_v62 }
  0xa7   :  { %605 = vmatmul.bf16.gmra.mxu0 %v1361_v6  ;;  %v1393_v6 = vor.u32 %v1581_v2, %v1392_v1 }
  0xa8   :  { %694 = vmatmul.bf16.gmra.mxu1 %v1365_v7  ;;  %v1397_v7 = vor.u32 %v1580_v3, %v1394_v4  ;;  %v1621_v4 = vld [vmem:[#allocation13 + $0x38] sm:$0xff] }
  0xa9   :  { %1128 = vmatpush.bf16.msra.mxu3 %v1621_v4 }
  0xb4   :  { %v571_v14 = vpop.f32.mrf.mxu0 }
  0xb5   :  { %v660_v15 = vpop.f32.mrf.mxu1 }
  0xb6   :  { %v661_v20 = vadd.f32 %v660_v15, %v571_v14  ;;  %v153_v14 = vmul.f32 %v1865_v17, %v120_v11 }
  0xb7   :  { %610 = vmatmul.bf16.gmra.mxu0 %v1369_v12  ;;  %v152_v12 = vmul.f32 %v1865_v17, %v119_v10 }
  0xb8   :  { %699 = vmatmul.bf16.gmra.mxu1 %v1373_v13  ;;  %v740_v25 = vadd.f32 %v661_v20, %v146_v19 }
  0xbc   :  { %v573_v22 = vpop.f32.mrf.mxu0 }
  0xbd   :  { %v662_v23 = vpop.f32.mrf.mxu1 }
  0xbe   :  { %v663_v24 = vadd.f32 %v662_v23, %v573_v22  ;;  %v1583_v22 = vld [vmem:[#allocation10 + $0xc4] sm:$0xf0]  ;;  %v1582_v23 = vld [vmem:[#allocation10 + $0xc4] sm:$0xf] }
  0xc0   :  { %v741_v26 = vadd.f32 %v663_v24, %v147_v21  ;;  %v1400_v21 = vld [vmem:[#allocation10 + $0xc0] sm:$0xf]  ;;  %v1402_v24 = vld [vmem:[#allocation10 + $0xc8] sm:$0xf0] }
  0xc1   :  { %v1405_v27 = vor.u32 %v1582_v23, %v1402_v24 }
  0xc2   :  { %v839_v31 = vpack.c.bf16 %v741_v26, %v740_v25  ;;  %v1401_v26 = vor.u32 %v1583_v22, %v1400_v21  ;;  %v1588_v21 = vld [vmem:[#allocation10 + $0xf4] sm:$0xf]  ;;  %v1426_v22 = vld [vmem:[#allocation10 + $0xf8] sm:$0xf0] }
  0xc4   :  { %931 = vmatmul.bf16.vlgmr.msra.gmra.mxu2 %v839_v31  ;;  %v576_v34 = vpop.f32.mrf.mxu0  ;;  %v122_v31 = vld [vmem:[#allocation8 + $0x48] sm:$0xff] }
  0xc5   :  { %v665_v35 = vpop.f32.mrf.mxu1 }
  0xc6   :  { %v666_v39 = vadd.f32 %v665_v35, %v576_v34  ;;  %v155_v34 = vmul.f32 %v1865_v17, %v122_v31  ;;  %v1616_v31 = vld [vmem:[#allocation13 + $0x10] sm:$0xff] }
  0xc7   :  { %615 = vmatmul.bf16.gmra.mxu0 %v1377_v32  ;;  %v154_v32 = vmul.f32 %v1865_v17, %v121_v30  ;;  %v128_v30 = vld [vmem:[#allocation8 + $0x78] sm:$0xff] }
  0xc8   :  { %704 = vmatmul.bf16.gmra.mxu1 %v1381_v33  ;;  %v742_v44 = vadd.f32 %v666_v39, %v148_v38 }
  0xcc   :  { %v578_v41 = vpop.f32.mrf.mxu0 }
  0xcd   :  { %v667_v42 = vpop.f32.mrf.mxu1 }
  0xce   :  { %v668_v43 = vadd.f32 %v667_v42, %v578_v41  ;;  %v1585_v41 = vld [vmem:[#allocation10 + $0xd4] sm:$0xf0]  ;;  %v1584_v42 = vld [vmem:[#allocation10 + $0xd4] sm:$0xf] }
  0xd0   :  { %v743_v45 = vadd.f32 %v668_v43, %v149_v40  ;;  %v1408_v40 = vld [vmem:[#allocation10 + $0xd0] sm:$0xf]  ;;  %v1410_v43 = vld [vmem:[#allocation10 + $0xd8] sm:$0xf0] }
  0xd1   :  { %v1413_v46 = vor.u32 %v1584_v42, %v1410_v43 }
  0xd2   :  { %v840_v50 = vpack.c.bf16 %v743_v45, %v742_v44  ;;  %v1409_v45 = vor.u32 %v1585_v41, %v1408_v40  ;;  %v1614_v41 = vld [vmem:[#allocation13] sm:$0xff] }
  0xd4   :  { %936 = vmatmul.bf16.gmra.mxu2 %v840_v50  ;;  %v581_v53 = vpop.f32.mrf.mxu0  ;;  %v124_v50 = vld [vmem:[#allocation8 + $0x58] sm:$0xff] }
  0xd5   :  { %v670_v54 = vpop.f32.mrf.mxu1 }
  0xd6   :  { %v671_v58 = vadd.f32 %v670_v54, %v581_v53  ;;  %v157_v53 = vmul.f32 %v1865_v17, %v124_v50 }
  0xd7   :  { %620 = vmatmul.bf16.gmra.mxu0 %v1385_v51  ;;  %v156_v51 = vmul.f32 %v1865_v17, %v123_v49 }
  0xd8   :  { %709 = vmatmul.bf16.gmra.mxu1 %v1389_v52  ;;  %v744_v63 = vadd.f32 %v671_v58, %v150_v57 }
  0xdc   :  { %v583_v60 = vpop.f32.mrf.mxu0 }
  0xdd   :  { %v672_v61 = vpop.f32.mrf.mxu1 }
  0xde   :  { %v673_v62 = vadd.f32 %v672_v61, %v583_v60  ;;  %v1587_v60 = vld [vmem:[#allocation10 + $0xe4] sm:$0xf0]  ;;  %v1586_v61 = vld [vmem:[#allocation10 + $0xe4] sm:$0xf] }
  0xe0   :  { %v745_v0 = vadd.f32 %v673_v62, %v151_v59  ;;  %v1416_v59 = vld [vmem:[#allocation10 + $0xe0] sm:$0xf]  ;;  %v1418_v62 = vld [vmem:[#allocation10 + $0xe8] sm:$0xf0] }
  0xe1   :  { %v1421_v1 = vor.u32 %v1586_v61, %v1418_v62  ;;  %v1888_v61 = vld [vmem:[%s1984_s5] ss:$0 sm:$0xff] }
  0xe2   :  { %v841_v5 = vpack.c.bf16 %v745_v0, %v744_v63  ;;  %v1417_v0 = vor.u32 %v1587_v60, %v1416_v59  ;;  %v131_v59 = vld [vmem:[#allocation8 + $0x90] sm:$0xff]  ;;  %v132_v60 = vld [vmem:[#allocation8 + $0x98] sm:$0xff] }
  0xe3   :  { %v164_v62 = vmul.f32 %v1865_v17, %v131_v59 }
  0xe4   :  { %941 = vmatmul.bf16.gmra.mxu2 %v841_v5  ;;  %v586_v8 = vpop.f32.mrf.mxu0  ;;  %v1620_v5 = vld [vmem:[#allocation13 + $0x30] sm:$0xff] }
  0xe5   :  { %v675_v9 = vpop.f32.mrf.mxu1  ;;  %1129 = vmatpush.bf16.msra.mxu3 %v1620_v5 }
  0xe6   :  { %v676_v13 = vadd.f32 %v675_v9, %v586_v8 }
  0xe7   :  { %625 = vmatmul.bf16.gmra.mxu0 %v1393_v6  ;;  %v125_v6 = vld [vmem:[#allocation8 + $0x60] sm:$0xff] }
  0xe8   :  { %714 = vmatmul.bf16.gmra.mxu1 %v1397_v7  ;;  %v746_v19 = vadd.f32 %v676_v13, %v152_v12  ;;  %v126_v7 = vld [vmem:[#allocation8 + $0x68] sm:$0xff]  ;;  %v158_v8 = vmul.f32 %v1865_v17, %v125_v6 }
  0xe9   :  { %v159_v10 = vmul.f32 %v1865_v17, %v126_v7  ;;  %v1619_v13 = vld [vmem:[#allocation13 + $0x28] sm:$0xff] }
  0xea   :  { %1130 = vmatpush.bf16.msra.mxu3 %v1619_v13 }
  0xec   :  { %v588_v15 = vpop.f32.mrf.mxu0 }
  0xed   :  { %v677_v16 = vpop.f32.mrf.mxu1 }
  0xee   :  { %v678_v18 = vadd.f32 %v677_v16, %v588_v15 }
  0xf0   :  { %v747_v20 = vadd.f32 %v678_v18, %v153_v14  ;;  %v1424_v18 = vld [vmem:[#allocation10 + $0xf0] sm:$0xf] }
  0xf2   :  { %v842_v25 = vpack.c.bf16 %v747_v20, %v746_v19  ;;  %v1618_v19 = vld [vmem:[#allocation13 + $0x20] sm:$0xff]  ;;  %v1589_v20 = vld [vmem:[#allocation10 + $0xf4] sm:$0xf0] }
  0xf3   :  { %1131 = vmatpush.bf16.msra.mxu3 %v1618_v19  ;;  %v1425_v24 = vor.u32 %v1589_v20, %v1424_v18  ;;  %v134_v18 = vld [vmem:[#allocation8 + $0xa8] sm:$0xff] }
  0xf4   :  { %946 = vmatmul.bf16.gmra.mxu2 %v842_v25  ;;  %v591_v28 = vpop.f32.mrf.mxu0  ;;  %v1429_v25 = vor.u32 %v1588_v21, %v1426_v22  ;;  %v167_v21 = vmul.f32 %v1865_v17, %v134_v18 }
  0xf5   :  { %v680_v29 = vpop.f32.mrf.mxu1 }
  0xf6   :  { %v681_v33 = vadd.f32 %v680_v29, %v591_v28  ;;  %v1617_v28 = vld [vmem:[#allocation13 + $0x18] sm:$0xff]  ;;  %v127_v29 = vld [vmem:[#allocation8 + $0x70] sm:$0xff] }
  0xf7   :  { %630 = vmatmul.bf16.gmra.mxu0 %v1401_v26  ;;  %1132 = vmatpush.bf16.msra.mxu3 %v1617_v28 }
  0xf8   :  { %719 = vmatmul.bf16.gmra.mxu1 %v1405_v27  ;;  %v748_v38 = vadd.f32 %v681_v33, %v154_v32  ;;  %v160_v32 = vmul.f32 %v1865_v17, %v127_v29 }
  0xfb   :  { %1133 = vmatpush.bf16.msra.mxu3 %v1616_v31 }
  0xfc   :  { %v593_v35 = vpop.f32.mrf.mxu0 }
  0xfd   :  { %v682_v36 = vpop.f32.mrf.mxu1 }
  0xfe   :  { %v683_v37 = vadd.f32 %v682_v36, %v593_v35 }
 0x100   :  { %v749_v39 = vadd.f32 %v683_v37, %v155_v34  ;;  %v161_v34 = vmul.f32 %v1865_v17, %v128_v30  ;;  %v1615_v37 = vld [vmem:[#allocation13 + $0x8] sm:$0xff] }
 0x101   :  { %1134 = vmatpush.bf16.msra.mxu3 %v1615_v37  ;;  %v135_v37 = vld [vmem:[#allocation8 + $0xb0] sm:$0xff] }
 0x102   :  { %v843_v44 = vpack.c.bf16 %v749_v39, %v748_v38 }
 0x104   :  { %951 = vmatmul.bf16.gmra.mxu2 %v843_v44  ;;  %v596_v47 = vpop.f32.mrf.mxu0 }
 0x105   :  { %v685_v48 = vpop.f32.mrf.mxu1  ;;  %1135 = vmatpush.bf16.msra.mxu3 %v1614_v41 }
 0x106   :  { %v686_v52 = vadd.f32 %v685_v48, %v596_v47 }
 0x107   :  { %635 = vmatmul.bf16.gmra.mxu0 %v1409_v45  ;;  %v129_v45 = vld [vmem:[#allocation8 + $0x80] sm:$0xff] }
 0x108   :  { %724 = vmatmul.bf16.gmra.mxu1 %v1413_v46  ;;  %v750_v57 = vadd.f32 %v686_v52, %v156_v51  ;;  %v130_v46 = vld [vmem:[#allocation8 + $0x88] sm:$0xff]  ;;  %v162_v47 = vmul.f32 %v1865_v17, %v129_v45 }
 0x109   :  { %v163_v49 = vmul.f32 %v1865_v17, %v130_v46 }
 0x10c   :  { %v598_v54 = vpop.f32.mrf.mxu0 }
 0x10d   :  { %v687_v55 = vpop.f32.mrf.mxu1 }
 0x10e   :  { %v688_v56 = vadd.f32 %v687_v55, %v598_v54 }
 0x110   :  { %v751_v58 = vadd.f32 %v688_v56, %v157_v53 }
 0x112   :  { %v844_v63 = vpack.c.bf16 %v751_v58, %v750_v57 }
 0x114   :  { %956 = vmatmul.bf16.gmra.mxu2 %v844_v63  ;;  %v601_v2 = vpop.f32.mrf.mxu0 }
 0x115   :  { %v690_v3 = vpop.f32.mrf.mxu1 }
 0x116   :  { %v691_v9 = vadd.f32 %v690_v3, %v601_v2 }
 0x117   :  { %640 = vmatmul.bf16.gmra.mxu0 %v1417_v0  ;;  %v165_v0 = vmul.f32 %v1865_v17, %v132_v60 }
 0x118   :  { %729 = vmatmul.bf16.gmra.mxu1 %v1421_v1  ;;  %v752_v15 = vadd.f32 %v691_v9, %v158_v8 }
 0x11c   :  { %v603_v11 = vpop.f32.mrf.mxu0 }
 0x11d   :  { %v692_v12 = vpop.f32.mrf.mxu1 }
 0x11e   :  { %v693_v14 = vadd.f32 %v692_v12, %v603_v11 }
 0x120   :  { %v753_v16 = vadd.f32 %v693_v14, %v159_v10 }
 0x122   :  { %v845_v23 = vpack.c.bf16 %v753_v16, %v752_v15  ;;  %v133_v16 = vld [vmem:[#allocation8 + $0xa0] sm:$0xff] }
 0x123   :  { %v166_v19 = vmul.f32 %v1865_v17, %v133_v16 }
 0x124   :  { %961 = vmatmul.bf16.gmra.mxu2 %v845_v23  ;;  %v606_v26 = vpop.f32.mrf.mxu0 }
 0x125   :  { %v695_v27 = vpop.f32.mrf.mxu1 }
 0x126   :  { %v696_v33 = vadd.f32 %v695_v27, %v606_v26 }
 0x127   :  { %645 = vmatmul.bf16.gmra.mxu0 %v1425_v24 }
 0x128   :  { %734 = vmatmul.bf16.gmra.mxu1 %v1429_v25  ;;  %v754_v39 = vadd.f32 %v696_v33, %v160_v32 }
 0x12c   :  { %v608_v35 = vpop.f32.mrf.mxu0 }
 0x12d   :  { %v697_v36 = vpop.f32.mrf.mxu1 }
 0x12e   :  { %v698_v38 = vadd.f32 %v697_v36, %v608_v35 }
 0x130   :  { %v755_v40 = vadd.f32 %v698_v38, %v161_v34  ;;  %v136_v38 = vld [vmem:[#allocation8 + $0xb8] sm:$0xff] }
 0x131   :  { %v169_v41 = vmul.f32 %v1865_v17, %v136_v38 }
 0x132   :  { %v846_v42 = vpack.c.bf16 %v755_v40, %v754_v39  ;;  %v168_v39 = vmul.f32 %v1865_v17, %v135_v37 }
 0x134   :  { %966 = vmatmul.bf16.gmra.mxu2 %v846_v42  ;;  %v611_v43 = vpop.f32.mrf.mxu0 }
 0x135   :  { %v700_v44 = vpop.f32.mrf.mxu1 }
 0x136   :  { %v701_v48 = vadd.f32 %v700_v44, %v611_v43 }
 0x138   :  { %v756_v53 = vadd.f32 %v701_v48, %v162_v47 }
 0x13c   :  { %v613_v50 = vpop.f32.mrf.mxu0 }
 0x13d   :  { %v702_v51 = vpop.f32.mrf.mxu1 }
 0x13e   :  { %v703_v52 = vadd.f32 %v702_v51, %v613_v50 }
 0x140   :  { %v757_v54 = vadd.f32 %v703_v52, %v163_v49 }
 0x142   :  { %v847_v55 = vpack.c.bf16 %v757_v54, %v756_v53 }
 0x144   :  { %971 = vmatmul.bf16.gmra.mxu2 %v847_v55  ;;  %v616_v56 = vpop.f32.mrf.mxu0 }
 0x145   :  { %v705_v57 = vpop.f32.mrf.mxu1 }
 0x146   :  { %v706_v63 = vadd.f32 %v705_v57, %v616_v56  ;;  %v137_v57 = vld [vmem:[#allocation8 + $0xc0] sm:$0xff] }
 0x147   :  { %v932_v58 = vpop.f32.mrf.mxu2  ;;  %v170_v59 = vmul.f32 %v1865_v17, %v137_v57 }
 0x148   :  { %v933_v3 = vadd.f32 %v1888_v61, %v932_v58  ;;  %v758_v6 = vadd.f32 %v706_v63, %v164_v62  ;;  %v138_v58 = vld [vmem:[#allocation8 + $0xc8] sm:$0xff] }
 0x149   :  { %v171_v62 = vmul.f32 %v1865_v17, %v138_v58 }
 0x14a   :  { %v1012_v9 = vmax.f32 %v933_v3, 0.0 }
 0x14c   :  { %v618_v1 = vpop.f32.mrf.mxu0 }
 0x14d   :  { %v707_v2 = vpop.f32.mrf.mxu1 }
 0x14e   :  { %v708_v4 = vadd.f32 %v707_v2, %v618_v1 }
 0x14f   :  { %v934_v5 = vpop.f32.mrf.mxu2 }
 0x150   :  { %v759_v7 = vadd.f32 %v708_v4, %v165_v0  ;;  %v935_v8 = vadd.f32 %v1888_v61, %v934_v5 }
 0x152   :  { %v1013_v10 = vmax.f32 %v935_v8, 0.0  ;;  %v848_v11 = vpack.c.bf16 %v759_v7, %v758_v6 }
 0x154   :  { %976 = vmatmul.bf16.gmra.mxu2 %v848_v11  ;;  %v1044_v12 = vpack.c.bf16 %v1013_v10, %v1012_v9  ;;  %v621_v13 = vpop.f32.mrf.mxu0 }
 0x155   :  { %v710_v14 = vpop.f32.mrf.mxu1 }
 0x156   :  { %1136 = vmatmul.bf16.vlgmr.msra.gmra.mxu3 %v1044_v12  ;;  %v711_v20 = vadd.f32 %v710_v14, %v621_v13  ;;  %v139_v14 = vld [vmem:[#allocation8 + $0xd0] sm:$0xff] }
 0x157   :  { %v937_v15 = vpop.f32.mrf.mxu2  ;;  %v172_v16 = vmul.f32 %v1865_v17, %v139_v14 }
 0x158   :  { %v938_v24 = vadd.f32 %v1888_v61, %v937_v15  ;;  %v760_v27 = vadd.f32 %v711_v20, %v166_v19  ;;  %v140_v15 = vld [vmem:[#allocation8 + $0xd8] sm:$0xff] }
 0x159   :  { %v173_v19 = vmul.f32 %v1865_v17, %v140_v15 }
 0x15a   :  { %v1014_v30 = vmax.f32 %v938_v24, 0.0 }
 0x15c   :  { %v623_v22 = vpop.f32.mrf.mxu0 }
 0x15d   :  { %v712_v23 = vpop.f32.mrf.mxu1 }
 0x15e   :  { %v713_v25 = vadd.f32 %v712_v23, %v623_v22 }
 0x15f   :  { %v939_v26 = vpop.f32.mrf.mxu2 }
 0x160   :  { %v761_v28 = vadd.f32 %v713_v25, %v167_v21  ;;  %v940_v29 = vadd.f32 %v1888_v61, %v939_v26 }
 0x162   :  { %v1015_v31 = vmax.f32 %v940_v29, 0.0  ;;  %v849_v32 = vpack.c.bf16 %v761_v28, %v760_v27 }
 0x164   :  { %981 = vmatmul.bf16.gmra.mxu2 %v849_v32  ;;  %v1045_v33 = vpack.c.bf16 %v1015_v31, %v1014_v30  ;;  %v626_v34 = vpop.f32.mrf.mxu0 }
 0x165   :  { %v715_v35 = vpop.f32.mrf.mxu1 }
 0x166   :  { %1141 = vmatmul.bf16.gmra.mxu3 %v1045_v33  ;;  %v716_v40 = vadd.f32 %v715_v35, %v626_v34  ;;  %v141_v35 = vld [vmem:[#allocation8 + $0xe0] sm:$0xff] }
 0x167   :  { %v942_v36 = vpop.f32.mrf.mxu2  ;;  %v174_v37 = vmul.f32 %v1865_v17, %v141_v35 }
 0x168   :  { %v943_v44 = vadd.f32 %v1888_v61, %v942_v36  ;;  %v762_v47 = vadd.f32 %v716_v40, %v168_v39  ;;  %v142_v36 = vld [vmem:[#allocation8 + $0xe8] sm:$0xff] }
 0x169   :  { %v175_v39 = vmul.f32 %v1865_v17, %v142_v36 }
 0x16a   :  { %v1016_v50 = vmax.f32 %v943_v44, 0.0 }
 0x16c   :  { %v628_v42 = vpop.f32.mrf.mxu0 }
 0x16d   :  { %v717_v43 = vpop.f32.mrf.mxu1 }
 0x16e   :  { %v718_v45 = vadd.f32 %v717_v43, %v628_v42 }
 0x16f   :  { %v944_v46 = vpop.f32.mrf.mxu2 }
 0x170   :  { %v763_v48 = vadd.f32 %v718_v45, %v169_v41  ;;  %v945_v49 = vadd.f32 %v1888_v61, %v944_v46 }
 0x172   :  { %v1017_v51 = vmax.f32 %v945_v49, 0.0  ;;  %v850_v52 = vpack.c.bf16 %v763_v48, %v762_v47 }
 0x174   :  { %986 = vmatmul.bf16.gmra.mxu2 %v850_v52  ;;  %v1046_v53 = vpack.c.bf16 %v1017_v51, %v1016_v50  ;;  %v631_v54 = vpop.f32.mrf.mxu0 }
 0x175   :  { %v720_v55 = vpop.f32.mrf.mxu1 }
 0x176   :  { %1146 = vmatmul.bf16.gmra.mxu3 %v1046_v53  ;;  %v721_v60 = vadd.f32 %v720_v55, %v631_v54  ;;  %v143_v55 = vld [vmem:[#allocation8 + $0xf0] sm:$0xff] }
 0x177   :  { %v947_v56 = vpop.f32.mrf.mxu2  ;;  %v176_v57 = vmul.f32 %v1865_v17, %v143_v55 }
 0x178   :  { %v948_v1 = vadd.f32 %v1888_v61, %v947_v56  ;;  %v764_v4 = vadd.f32 %v721_v60, %v170_v59  ;;  %v144_v56 = vld [vmem:[#allocation8 + $0xf8] sm:$0xff] }
 0x179   :  { %v177_v59 = vmul.f32 %v1865_v17, %v144_v56 }
 0x17a   :  { %v1018_v7 = vmax.f32 %v948_v1, 0.0 }
 0x17c   :  { %v633_v63 = vpop.f32.mrf.mxu0 }
 0x17d   :  { %v722_v0 = vpop.f32.mrf.mxu1 }
 0x17e   :  { %v723_v2 = vadd.f32 %v722_v0, %v633_v63 }
 0x17f   :  { %v949_v3 = vpop.f32.mrf.mxu2 }
 0x180   :  { %v765_v5 = vadd.f32 %v723_v2, %v171_v62  ;;  %v950_v6 = vadd.f32 %v1888_v61, %v949_v3 }
 0x182   :  { %v1019_v8 = vmax.f32 %v950_v6, 0.0  ;;  %v851_v9 = vpack.c.bf16 %v765_v5, %v764_v4 }
 0x184   :  { %991 = vmatmul.bf16.gmra.mxu2 %v851_v9  ;;  %v1047_v10 = vpack.c.bf16 %v1019_v8, %v1018_v7  ;;  %v636_v11 = vpop.f32.mrf.mxu0 }
 0x185   :  { %v725_v12 = vpop.f32.mrf.mxu1 }
 0x186   :  { %1151 = vmatmul.bf16.gmra.mxu3 %v1047_v10  ;;  %v726_v18 = vadd.f32 %v725_v12, %v636_v11 }
 0x187   :  { %v952_v13 = vpop.f32.mrf.mxu2 }
 0x188   :  { %v953_v22 = vadd.f32 %v1888_v61, %v952_v13  ;;  %v766_v25 = vadd.f32 %v726_v18, %v172_v16 }
 0x18a   :  { %v1020_v28 = vmax.f32 %v953_v22, 0.0 }
 0x18c   :  { %v638_v20 = vpop.f32.mrf.mxu0 }
 0x18d   :  { %v727_v21 = vpop.f32.mrf.mxu1 }
 0x18e   :  { %v728_v23 = vadd.f32 %v727_v21, %v638_v20 }
 0x18f   :  { %v954_v24 = vpop.f32.mrf.mxu2 }
 0x190   :  { %v767_v26 = vadd.f32 %v728_v23, %v173_v19  ;;  %v955_v27 = vadd.f32 %v1888_v61, %v954_v24  ;;  %v1925_v23 = vld [vmem:[%s1986_s7] ss:$0 sm:$0xff]  ;;  %s1795_s7 = smov [#allocation14]  }
 0x191   :  { %s1285_s14 = sshll.u32 %s1795_s7, 4  ;;  %s1286_s14 = int_to_ptr.vmem [resolvable:$true] %s1285_s14 }
 0x192   :  { %v1021_v29 = vmax.f32 %v955_v27, 0.0  ;;  %v852_v30 = vpack.c.bf16 %v767_v26, %v766_v25 }
 0x194   :  { %996 = vmatmul.bf16.gmra.mxu2 %v852_v30  ;;  %v1048_v31 = vpack.c.bf16 %v1021_v29, %v1020_v28  ;;  %v641_v32 = vpop.f32.mrf.mxu0 }
 0x195   :  { %v730_v33 = vpop.f32.mrf.mxu1 }
 0x196   :  { %1156 = vmatmul.bf16.gmra.mxu3 %v1048_v31  ;;  %v731_v38 = vadd.f32 %v730_v33, %v641_v32 }
 0x197   :  { %v957_v34 = vpop.f32.mrf.mxu2 }
 0x198   :  { %v958_v42 = vadd.f32 %v1888_v61, %v957_v34  ;;  %v768_v45 = vadd.f32 %v731_v38, %v174_v37 }
 0x19a   :  { %v1022_v48 = vmax.f32 %v958_v42, 0.0 }
 0x19c   :  { %v643_v40 = vpop.f32.mrf.mxu0 }
 0x19d   :  { %v732_v41 = vpop.f32.mrf.mxu1 }
 0x19e   :  { %v733_v43 = vadd.f32 %v732_v41, %v643_v40 }
 0x19f   :  { %v959_v44 = vpop.f32.mrf.mxu2 }
 0x1a0   :  { %v769_v46 = vadd.f32 %v733_v43, %v175_v39  ;;  %v960_v47 = vadd.f32 %v1888_v61, %v959_v44 }
 0x1a2   :  { %v1023_v49 = vmax.f32 %v960_v47, 0.0  ;;  %v853_v50 = vpack.c.bf16 %v769_v46, %v768_v45 }
 0x1a4   :  { %1001 = vmatmul.bf16.gmra.mxu2 %v853_v50  ;;  %v1049_v51 = vpack.c.bf16 %v1023_v49, %v1022_v48  ;;  %v646_v52 = vpop.f32.mrf.mxu0 }
 0x1a5   :  { %v735_v53 = vpop.f32.mrf.mxu1 }
 0x1a6   :  { %1161 = vmatmul.bf16.gmra.mxu3 %v1049_v51  ;;  %v736_v58 = vadd.f32 %v735_v53, %v646_v52 }
 0x1a7   :  { %v962_v54 = vpop.f32.mrf.mxu2 }
 0x1a8   :  { %v963_v63 = vadd.f32 %v1888_v61, %v962_v54  ;;  %v770_v2 = vadd.f32 %v736_v58, %v176_v57 }
 0x1aa   :  { %v1024_v5 = vmax.f32 %v963_v63, 0.0 }
 0x1ac   :  { %v648_v60 = vpop.f32.mrf.mxu0 }
 0x1ad   :  { %v737_v62 = vpop.f32.mrf.mxu1 }
 0x1ae   :  { %v738_v0 = vadd.f32 %v737_v62, %v648_v60 }
 0x1af   :  { %v964_v1 = vpop.f32.mrf.mxu2 }
 0x1b0   :  { %v771_v3 = vadd.f32 %v738_v0, %v177_v59  ;;  %v965_v4 = vadd.f32 %v1888_v61, %v964_v1 }
 0x1b2   :  { %v1025_v6 = vmax.f32 %v965_v4, 0.0  ;;  %v854_v7 = vpack.c.bf16 %v771_v3, %v770_v2 }
 0x1b4   :  { %1006 = vmatmul.bf16.gmra.mxu2 %v854_v7  ;;  %v1050_v8 = vpack.c.bf16 %v1025_v6, %v1024_v5 }
 0x1b6   :  { %1166 = vmatmul.bf16.gmra.mxu3 %v1050_v8 }
 0x1b7   :  { %v967_v9 = vpop.f32.mrf.mxu2 }
 0x1b8   :  { %v968_v10 = vadd.f32 %v1888_v61, %v967_v9 }
 0x1ba   :  { %v1026_v12 = vmax.f32 %v968_v10, 0.0 }
 0x1bf   :  { %v969_v17 = vpop.f32.mrf.mxu2 }
 0x1c0   :  { %v970_v11 = vadd.f32 %v1888_v61, %v969_v17 }
 0x1c2   :  { %v1027_v13 = vmax.f32 %v970_v11, 0.0 }
 0x1c4   :  { %v1051_v14 = vpack.c.bf16 %v1027_v13, %v1026_v12 }
 0x1c6   :  { %1171 = vmatmul.bf16.gmra.mxu3 %v1051_v14 }
 0x1c7   :  { %v972_v15 = vpop.f32.mrf.mxu2 }
 0x1c8   :  { %v973_v16 = vadd.f32 %v1888_v61, %v972_v15 }
 0x1ca   :  { %v1028_v20 = vmax.f32 %v973_v16, 0.0 }
 0x1cf   :  { %v974_v18 = vpop.f32.mrf.mxu2 }
 0x1d0   :  { %v975_v19 = vadd.f32 %v1888_v61, %v974_v18 }
 0x1d2   :  { %v1029_v21 = vmax.f32 %v975_v19, 0.0 }
 0x1d4   :  { %v1052_v22 = vpack.c.bf16 %v1029_v21, %v1028_v20 }
 0x1d6   :  { %1176 = vmatmul.bf16.gmra.mxu3 %v1052_v22 }
 0x1d7   :  { %v977_v24 = vpop.f32.mrf.mxu2 }
 0x1d8   :  { %v978_v28 = vadd.f32 %v1888_v61, %v977_v24 }
 0x1d9   :  { %v1137_v25 = vpop.f32.mrf.mxu3 }
 0x1da   :  { %v1138_v26 = vadd.f32 %v1925_v23, %v1137_v25  ;;  %v1030_v32 = vmax.f32 %v978_v28, 0.0 }
 0x1dc   :  { %v1217_v27 = vmax.f32 %v1138_v26, 0.0 }
 0x1de   :  { %1249 = vst [vmem:[#allocation14] sm:$0xff] %v1217_v27 }
 0x1df   :  { %v979_v29 = vpop.f32.mrf.mxu2 }
 0x1e0   :  { %v980_v30 = vadd.f32 %v1888_v61, %v979_v29 }
 0x1e1   :  { %v1139_v31 = vpop.f32.mrf.mxu3 }
 0x1e2   :  { %v1031_v33 = vmax.f32 %v980_v30, 0.0  ;;  %v1140_v34 = vadd.f32 %v1925_v23, %v1139_v31 }
 0x1e4   :  { %v1218_v35 = vmax.f32 %v1140_v34, 0.0  ;;  %v1053_v36 = vpack.c.bf16 %v1031_v33, %v1030_v32 }
 0x1e6   :  { %1250 = vst [vmem:[#allocation14 + $0x8] sm:$0xff] %v1218_v35  ;;  %1181 = vmatmul.bf16.gmra.mxu3 %v1053_v36 }
 0x1e7   :  { %v982_v37 = vpop.f32.mrf.mxu2 }
 0x1e8   :  { %v983_v41 = vadd.f32 %v1888_v61, %v982_v37 }
 0x1e9   :  { %v1142_v38 = vpop.f32.mrf.mxu3 }
 0x1ea   :  { %v1143_v39 = vadd.f32 %v1925_v23, %v1142_v38  ;;  %v1032_v45 = vmax.f32 %v983_v41, 0.0 }
 0x1ec   :  { %v1219_v40 = vmax.f32 %v1143_v39, 0.0 }
 0x1ee   :  { %1251 = vst [vmem:[#allocation14 + $0x10] sm:$0xff] %v1219_v40 }
 0x1ef   :  { %v984_v42 = vpop.f32.mrf.mxu2 }
 0x1f0   :  { %v985_v43 = vadd.f32 %v1888_v61, %v984_v42 }
 0x1f1   :  { %v1144_v44 = vpop.f32.mrf.mxu3 }
 0x1f2   :  { %v1033_v46 = vmax.f32 %v985_v43, 0.0  ;;  %v1145_v47 = vadd.f32 %v1925_v23, %v1144_v44 }
 0x1f4   :  { %v1220_v48 = vmax.f32 %v1145_v47, 0.0  ;;  %v1054_v49 = vpack.c.bf16 %v1033_v46, %v1032_v45 }
 0x1f6   :  { %1252 = vst [vmem:[#allocation14 + $0x18] sm:$0xff] %v1220_v48  ;;  %1186 = vmatmul.bf16.gmra.mxu3 %v1054_v49 }
 0x1f7   :  { %v987_v50 = vpop.f32.mrf.mxu2 }
 0x1f8   :  { %v988_v54 = vadd.f32 %v1888_v61, %v987_v50 }
 0x1f9   :  { %v1147_v51 = vpop.f32.mrf.mxu3 }
 0x1fa   :  { %v1148_v52 = vadd.f32 %v1925_v23, %v1147_v51  ;;  %v1034_v58 = vmax.f32 %v988_v54, 0.0 }
 0x1fc   :  { %v1221_v53 = vmax.f32 %v1148_v52, 0.0 }
 0x1fe   :  { %1253 = vst [vmem:[#allocation14 + $0x20] sm:$0xff] %v1221_v53 }
 0x1ff   :  { %v989_v55 = vpop.f32.mrf.mxu2 }
 0x200   :  { %v990_v56 = vadd.f32 %v1888_v61, %v989_v55 }
 0x201   :  { %v1149_v57 = vpop.f32.mrf.mxu3 }
 0x202   :  { %v1035_v59 = vmax.f32 %v990_v56, 0.0  ;;  %v1150_v60 = vadd.f32 %v1925_v23, %v1149_v57 }
 0x204   :  { %v1222_v62 = vmax.f32 %v1150_v60, 0.0  ;;  %v1055_v63 = vpack.c.bf16 %v1035_v59, %v1034_v58 }
 0x206   :  { %1254 = vst [vmem:[#allocation14 + $0x28] sm:$0xff] %v1222_v62  ;;  %1191 = vmatmul.bf16.gmra.mxu3 %v1055_v63 }
 0x207   :  { %v992_v0 = vpop.f32.mrf.mxu2 }
 0x208   :  { %v993_v4 = vadd.f32 %v1888_v61, %v992_v0 }
 0x209   :  { %v1152_v1 = vpop.f32.mrf.mxu3 }
 0x20a   :  { %v1153_v2 = vadd.f32 %v1925_v23, %v1152_v1  ;;  %v1036_v8 = vmax.f32 %v993_v4, 0.0 }
 0x20c   :  { %v1223_v3 = vmax.f32 %v1153_v2, 0.0 }
 0x20e   :  { %1255 = vst [vmem:[#allocation14 + $0x30] sm:$0xff] %v1223_v3 }
 0x20f   :  { %v994_v5 = vpop.f32.mrf.mxu2 }
 0x210   :  { %v995_v6 = vadd.f32 %v1888_v61, %v994_v5 }
 0x211   :  { %v1154_v7 = vpop.f32.mrf.mxu3 }
 0x212   :  { %v1037_v9 = vmax.f32 %v995_v6, 0.0  ;;  %v1155_v10 = vadd.f32 %v1925_v23, %v1154_v7 }
 0x214   :  { %v1056_v17 = vpack.c.bf16 %v1037_v9, %v1036_v8  ;;  %v1224_v11 = vmax.f32 %v1155_v10, 0.0 }
 0x216   :  { %1256 = vst [vmem:[#allocation14 + $0x38] sm:$0xff] %v1224_v11  ;;  %1196 = vmatmul.bf16.gmra.mxu3 %v1056_v17 }
 0x217   :  { %v997_v12 = vpop.f32.mrf.mxu2 }
 0x218   :  { %v998_v16 = vadd.f32 %v1888_v61, %v997_v12 }
 0x219   :  { %v1157_v13 = vpop.f32.mrf.mxu3 }
 0x21a   :  { %v1158_v14 = vadd.f32 %v1925_v23, %v1157_v13  ;;  %v1038_v21 = vmax.f32 %v998_v16, 0.0 }
 0x21c   :  { %v1225_v15 = vmax.f32 %v1158_v14, 0.0 }
 0x21e   :  { %1257 = vst [vmem:[#allocation14 + $0x40] sm:$0xff] %v1225_v15 }
 0x21f   :  { %v999_v18 = vpop.f32.mrf.mxu2 }
 0x220   :  { %v1000_v19 = vadd.f32 %v1888_v61, %v999_v18 }
 0x221   :  { %v1159_v20 = vpop.f32.mrf.mxu3 }
 0x222   :  { %v1039_v22 = vmax.f32 %v1000_v19, 0.0  ;;  %v1160_v24 = vadd.f32 %v1925_v23, %v1159_v20 }
 0x224   :  { %v1057_v25 = vpack.c.bf16 %v1039_v22, %v1038_v21  ;;  %v1226_v26 = vmax.f32 %v1160_v24, 0.0 }
 0x226   :  { %1258 = vst [vmem:[#allocation14 + $0x48] sm:$0xff] %v1226_v26  ;;  %1201 = vmatmul.bf16.gmra.mxu3 %v1057_v25 }
 0x227   :  { %v1002_v27 = vpop.f32.mrf.mxu2 }
 0x228   :  { %v1003_v31 = vadd.f32 %v1888_v61, %v1002_v27 }
 0x229   :  { %v1162_v28 = vpop.f32.mrf.mxu3 }
 0x22a   :  { %v1163_v29 = vadd.f32 %v1925_v23, %v1162_v28  ;;  %v1040_v35 = vmax.f32 %v1003_v31, 0.0 }
 0x22c   :  { %v1227_v30 = vmax.f32 %v1163_v29, 0.0 }
 0x22e   :  { %1259 = vst [vmem:[#allocation14 + $0x50] sm:$0xff] %v1227_v30 }
 0x22f   :  { %v1004_v32 = vpop.f32.mrf.mxu2 }
 0x230   :  { %v1005_v33 = vadd.f32 %v1888_v61, %v1004_v32 }
 0x231   :  { %v1164_v34 = vpop.f32.mrf.mxu3 }
 0x232   :  { %v1041_v36 = vmax.f32 %v1005_v33, 0.0  ;;  %v1165_v37 = vadd.f32 %v1925_v23, %v1164_v34 }
 0x234   :  { %v1058_v38 = vpack.c.bf16 %v1041_v36, %v1040_v35  ;;  %v1228_v39 = vmax.f32 %v1165_v37, 0.0 }
 0x236   :  { %1260 = vst [vmem:[#allocation14 + $0x58] sm:$0xff] %v1228_v39  ;;  %1206 = vmatmul.bf16.gmra.mxu3 %v1058_v38 }
 0x237   :  { %v1007_v40 = vpop.f32.mrf.mxu2 }
 0x238   :  { %v1008_v44 = vadd.f32 %v1888_v61, %v1007_v40 }
 0x239   :  { %v1167_v41 = vpop.f32.mrf.mxu3 }
 0x23a   :  { %v1168_v42 = vadd.f32 %v1925_v23, %v1167_v41  ;;  %v1042_v48 = vmax.f32 %v1008_v44, 0.0 }
 0x23c   :  { %v1229_v43 = vmax.f32 %v1168_v42, 0.0 }
 0x23e   :  { %1261 = vst [vmem:[#allocation14 + $0x60] sm:$0xff] %v1229_v43 }
 0x23f   :  { %v1009_v45 = vpop.f32.mrf.mxu2 }
 0x240   :  { %v1010_v46 = vadd.f32 %v1888_v61, %v1009_v45 }
 0x241   :  { %v1169_v47 = vpop.f32.mrf.mxu3 }
 0x242   :  { %v1043_v49 = vmax.f32 %v1010_v46, 0.0  ;;  %v1170_v50 = vadd.f32 %v1925_v23, %v1169_v47 }
 0x244   :  { %v1059_v51 = vpack.c.bf16 %v1043_v49, %v1042_v48  ;;  %v1230_v52 = vmax.f32 %v1170_v50, 0.0 }
 0x246   :  { %1262 = vst [vmem:[#allocation14 + $0x68] sm:$0xff] %v1230_v52  ;;  %1211 = vmatmul.bf16.gmra.mxu3 %v1059_v51 }
 0x249   :  { %v1172_v53 = vpop.f32.mrf.mxu3 }
 0x24a   :  { %v1173_v54 = vadd.f32 %v1925_v23, %v1172_v53 }
 0x24c   :  { %v1231_v55 = vmax.f32 %v1173_v54, 0.0 }
 0x24e   :  { %1263 = vst [vmem:[#allocation14 + $0x70] sm:$0xff] %v1231_v55 }
 0x251   :  { %v1174_v56 = vpop.f32.mrf.mxu3 }
 0x252   :  { %v1175_v57 = vadd.f32 %v1925_v23, %v1174_v56 }
 0x254   :  { %v1232_v58 = vmax.f32 %v1175_v57, 0.0 }
 0x256   :  { %1264 = vst [vmem:[#allocation14 + $0x78] sm:$0xff] %v1232_v58 }
 0x259   :  { %v1177_v61 = vpop.f32.mrf.mxu3 }
 0x25a   :  { %v1178_v59 = vadd.f32 %v1925_v23, %v1177_v61 }
 0x25c   :  { %v1233_v60 = vmax.f32 %v1178_v59, 0.0 }
 0x25e   :  { %1265 = vst [vmem:[#allocation14 + $0x80] sm:$0xff] %v1233_v60 }
 0x261   :  { %v1179_v62 = vpop.f32.mrf.mxu3 }
 0x262   :  { %v1180_v63 = vadd.f32 %v1925_v23, %v1179_v62 }
 0x264   :  { %v1234_v0 = vmax.f32 %v1180_v63, 0.0 }
 0x266   :  { %1266 = vst [vmem:[#allocation14 + $0x88] sm:$0xff] %v1234_v0 }
 0x269   :  { %v1182_v1 = vpop.f32.mrf.mxu3 }
 0x26a   :  { %v1183_v2 = vadd.f32 %v1925_v23, %v1182_v1 }
 0x26c   :  { %v1235_v3 = vmax.f32 %v1183_v2, 0.0 }
 0x26e   :  { %1267 = vst [vmem:[#allocation14 + $0x90] sm:$0xff] %v1235_v3 }
 0x271   :  { %v1184_v4 = vpop.f32.mrf.mxu3 }
 0x272   :  { %v1185_v5 = vadd.f32 %v1925_v23, %v1184_v4 }
 0x274   :  { %v1236_v6 = vmax.f32 %v1185_v5, 0.0 }
 0x276   :  { %1268 = vst [vmem:[#allocation14 + $0x98] sm:$0xff] %v1236_v6 }
 0x279   :  { %v1187_v7 = vpop.f32.mrf.mxu3 }
 0x27a   :  { %v1188_v8 = vadd.f32 %v1925_v23, %v1187_v7 }
 0x27c   :  { %v1237_v9 = vmax.f32 %v1188_v8, 0.0 }
 0x27e   :  { %1269 = vst [vmem:[#allocation14 + $0xa0] sm:$0xff] %v1237_v9 }
 0x281   :  { %v1189_v10 = vpop.f32.mrf.mxu3 }
 0x282   :  { %v1190_v17 = vadd.f32 %v1925_v23, %v1189_v10 }
 0x284   :  { %v1238_v11 = vmax.f32 %v1190_v17, 0.0 }
 0x286   :  { %1270 = vst [vmem:[#allocation14 + $0xa8] sm:$0xff] %v1238_v11 }
 0x289   :  { %v1192_v12 = vpop.f32.mrf.mxu3 }
 0x28a   :  { %v1193_v13 = vadd.f32 %v1925_v23, %v1192_v12 }
 0x28c   :  { %v1239_v14 = vmax.f32 %v1193_v13, 0.0 }
 0x28e   :  { %1271 = vst [vmem:[#allocation14 + $0xb0] sm:$0xff] %v1239_v14 }
 0x291   :  { %v1194_v15 = vpop.f32.mrf.mxu3 }
 0x292   :  { %v1195_v16 = vadd.f32 %v1925_v23, %v1194_v15 }
 0x294   :  { %v1240_v18 = vmax.f32 %v1195_v16, 0.0 }
 0x296   :  { %1272 = vst [vmem:[#allocation14 + $0xb8] sm:$0xff] %v1240_v18 }
 0x299   :  { %v1197_v19 = vpop.f32.mrf.mxu3 }
 0x29a   :  { %v1198_v20 = vadd.f32 %v1925_v23, %v1197_v19 }
 0x29c   :  { %v1241_v21 = vmax.f32 %v1198_v20, 0.0 }
 0x29e   :  { %1273 = vst [vmem:[#allocation14 + $0xc0] sm:$0xff] %v1241_v21 }
 0x2a1   :  { %v1199_v22 = vpop.f32.mrf.mxu3 }
 0x2a2   :  { %v1200_v24 = vadd.f32 %v1925_v23, %v1199_v22 }
 0x2a4   :  { %v1242_v25 = vmax.f32 %v1200_v24, 0.0 }
 0x2a6   :  { %1274 = vst [vmem:[#allocation14 + $0xc8] sm:$0xff] %v1242_v25 }
 0x2a9   :  { %v1202_v26 = vpop.f32.mrf.mxu3 }
 0x2aa   :  { %v1203_v27 = vadd.f32 %v1925_v23, %v1202_v26 }
 0x2ac   :  { %v1243_v28 = vmax.f32 %v1203_v27, 0.0 }
 0x2ae   :  { %1275 = vst [vmem:[#allocation14 + $0xd0] sm:$0xff] %v1243_v28 }
 0x2b1   :  { %v1204_v29 = vpop.f32.mrf.mxu3 }
 0x2b2   :  { %v1205_v30 = vadd.f32 %v1925_v23, %v1204_v29 }
 0x2b4   :  { %v1244_v31 = vmax.f32 %v1205_v30, 0.0 }
 0x2b6   :  { %1276 = vst [vmem:[#allocation14 + $0xd8] sm:$0xff] %v1244_v31 }
 0x2b9   :  { %v1207_v32 = vpop.f32.mrf.mxu3 }
 0x2ba   :  { %v1208_v33 = vadd.f32 %v1925_v23, %v1207_v32 }
 0x2bc   :  { %v1245_v34 = vmax.f32 %v1208_v33, 0.0 }
 0x2be   :  { %1277 = vst [vmem:[#allocation14 + $0xe0] sm:$0xff] %v1245_v34 }
 0x2c1   :  { %v1209_v35 = vpop.f32.mrf.mxu3 }
 0x2c2   :  { %v1210_v36 = vadd.f32 %v1925_v23, %v1209_v35 }
 0x2c4   :  { %v1246_v37 = vmax.f32 %v1210_v36, 0.0 }
 0x2c6   :  { %1278 = vst [vmem:[#allocation14 + $0xe8] sm:$0xff] %v1246_v37 }
 0x2c9   :  { %v1212_v38 = vpop.f32.mrf.mxu3 }
 0x2ca   :  { %v1213_v39 = vadd.f32 %v1925_v23, %v1212_v38 }
 0x2cc   :  { %v1247_v40 = vmax.f32 %v1213_v39, 0.0 }
 0x2ce   :  { %1279 = vst [vmem:[#allocation14 + $0xf0] sm:$0xff] %v1247_v40 }
 0x2d1   :  { %v1214_v41 = vpop.f32.mrf.mxu3 }
 0x2d2   :  { %v1215_v42 = vadd.f32 %v1925_v23, %v1214_v41 }
 0x2d4   :  { %v1248_v43 = vmax.f32 %v1215_v42, 0.0 }
 0x2d6   :  { %1280 = vst [vmem:[#allocation14 + $0xf8] sm:$0xff] %v1248_v43 }
 0x2d7   :  { %1293 = dma.vmem_to_hbm [thread:$0]  %s1286_s14, 4096, %s1288_s17, [#allocation7], %s1787_s10, %s1787_s10, %s1788_s11  }
 0x2d8   :  { %1784 = dma.done.wait [#allocation7], 4096  }
 0x2d9   :  { %1785 = vsyncadd [#allocation7], 4294963200 }
 0x2da   :  { %1298 = vsyncpa [#allocation6], 1 }
 0x2db   :  { %1299 = vsyncpa [#allocation9], 1 }
 0x2dc   :  { %1300 = vsyncpa [#allocation12], 1 }
 0x2dd   :  { %1301 = vsyncpa [#allocation7], 1 }

</bundles_post_ra>
